<compile_context>
chip_gen: v7x
topology: tpu7x:2x2x1
jax: 0.10.0
libtpu: 0.0.40
codegen_flags: <defaults>
</compile_context>

<pallas_src>
import functools

import jax
import jax.numpy as jnp
from jax import lax
from jax.experimental import pallas as pl
from jax.experimental.pallas import tpu as pltpu

EPS = 1e-6
NUM_GROUPS = 32          # Normalize() = GroupNorm(32, C, eps=1e-6, affine=True)
VMEM_LIMIT_BYTES = 48 * 1024 * 1024   # explicit, with headroom for v7x's 64 MiB VMEM


# --------------------------------------------------------------------------------------
# Kernel 1: GroupNorm + fused QKV projection (per batch element).
# --------------------------------------------------------------------------------------
def norm_qkv_kernel(x_ref, gamma_ref, beta_ref, gred_ref, gexp_ref,
                    wqkv_ref, bqkv_ref, q_ref, k_ref, v_ref):
    x = x_ref[0]                                   # (H, C) f32
    H, C = x.shape
    inv_h = 1.0 / H

    # Two-pass GroupNorm (avoids E[x^2]-E[x]^2 cancellation).  Group reduce/expand are
    # tiny factored matmuls: (1,C)@(C,G) then (1,G)@(G,C) -- no dense (C,C) gmat.
    mean_c = jnp.sum(x, axis=0, keepdims=True) * inv_h                       # (1, C)
    gmean = jnp.dot(jnp.dot(mean_c, gred_ref[...],
                            preferred_element_type=jnp.float32),
                    gexp_ref[...], preferred_element_type=jnp.float32)       # (1, C)
    d = x - gmean
    msd_c = jnp.sum(d * d, axis=0, keepdims=True) * inv_h                    # (1, C)
    gvar = jnp.dot(jnp.dot(msd_c, gred_ref[...],
                           preferred_element_type=jnp.float32),
                   gexp_ref[...], preferred_element_type=jnp.float32)        # (1, C)
    xn = d * lax.rsqrt(gvar + EPS) * gamma_ref[...] + beta_ref[...]          # (H, C) f32

    # Single fused QKV matmul: bf16 operands, f32 accumulation.
    qkv = jnp.dot(xn.astype(jnp.bfloat16), wqkv_ref[...],
                  preferred_element_type=jnp.float32) + bqkv_ref[...]        # (H, 3C) f32

    q_ref[0] = qkv[:, :C].astype(jnp.bfloat16)
    k_ref[0] = qkv[:, C:2 * C].astype(jnp.bfloat16)
    v_ref[0] = qkv[:, 2 * C:].astype(jnp.bfloat16)


# --------------------------------------------------------------------------------------
# Kernel 2: flash attention (online softmax) + proj_out + residual.
# Grid: (B, num_q_tiles, num_kv_tiles), kv axis is the "arbitrary" (innermost) axis.
# --------------------------------------------------------------------------------------
def flash_attn_kernel(x_ref, q_ref, k_ref, v_ref, wp_ref, bp_ref, o_ref,
                      m_sc, l_sc, acc_sc, *, scale):
    kv = pl.program_id(2)

    @pl.when(kv == 0)
    def _init():
        m_sc[...] = jnp.full_like(m_sc, -jnp.inf)
        l_sc[...] = jnp.zeros_like(l_sc)
        acc_sc[...] = jnp.zeros_like(acc_sc)

    q = q_ref[0]                                   # (tq, C) bf16
    k = k_ref[0]                                   # (tk, C) bf16
    v = v_ref[0]                                   # (tk, C) bf16

    # QK^T without materializing k.T: contract the last dim of both operands.
    s = lax.dot_general(q, k, (((1,), (1,)), ((), ())),
                        preferred_element_type=jnp.float32) * scale          # (tq, tk) f32

    m_prev = m_sc[...]
    m_new = jnp.maximum(m_prev, jnp.max(s, axis=-1, keepdims=True))
    alpha = jnp.exp(m_prev - m_new)
    p = jnp.exp(s - m_new)                                                   # f32
    l_sc[...] = alpha * l_sc[...] + jnp.sum(p, axis=-1, keepdims=True)
    acc_sc[...] = alpha * acc_sc[...] + jnp.dot(p.astype(jnp.bfloat16), v,
                                                preferred_element_type=jnp.float32)
    m_sc[...] = m_new

    @pl.when(kv == pl.num_programs(2) - 1)
    def _finalize():
        o = acc_sc[...] * pl.reciprocal(l_sc[...], approx=True)              # (tq, C) f32
        y = jnp.dot(o.astype(jnp.bfloat16), wp_ref[...],
                    preferred_element_type=jnp.float32) + bp_ref[...]        # (tq, C) f32
        o_ref[0] = (x_ref[0] + y).astype(o_ref.dtype)


def _pick_tile(H):
    # Largest "nice" tile that divides H.  512 is a good sweet spot for v5e/v6e
    # (128 MiB VMEM) and still fits the v7x 64 MiB budget at these block shapes.
    for t in (512, 256, 128):
        if H % t == 0:
            return t
    return H


# --------------------------------------------------------------------------------------
# Wrapper.
# --------------------------------------------------------------------------------------
def attn_block(x_nch, params):
    """x_nch: (B, C, H) float32 -- same layout/semantics as the PyTorch module."""
    gamma, beta, wq, bq, wk, bk, wv, bv, wp, bp = params
    B, C, H = x_nch.shape
    assert C % NUM_GROUPS == 0
    G = NUM_GROUPS
    gs = C // G

    # TODO(synk): keep the surrounding model in (B, H, C) layout to avoid these transposes.
    x_t = jnp.transpose(x_nch, (0, 2, 1)).astype(jnp.float32)                # (B, H, C)

    gamma2 = gamma.reshape(1, C).astype(jnp.float32)
    beta2 = beta.reshape(1, C).astype(jnp.float32)

    # Factored group-average matrices: reduce (C, G) and expand (G, C).
    gid = jnp.arange(C) // gs
    onehot = (gid[:, None] == jnp.arange(G)[None, :]).astype(jnp.float32)    # (C, G)
    gred = onehot / gs                                                       # (C, G)
    gexp = onehot.T                                                          # (G, C)

    # Fused QKV weight (C, 3C) in bf16; biases stay f32.  Conv1d weight (out,in,1) is
    # stored PyTorch-style as (out, in) -> transpose to (in, out) for channels-last matmul.
    wqkv = jnp.concatenate([wq.T, wk.T, wv.T], axis=1).astype(jnp.bfloat16)  # (C, 3C)
    bqkv = jnp.concatenate([bq, bk, bv]).reshape(1, 3 * C).astype(jnp.float32)
    wp_t = wp.T.astype(jnp.bfloat16)                                         # (C, C)
    bp2 = bp.reshape(1, C).astype(jnp.float32)

    full1 = lambda shape: pl.BlockSpec(shape, lambda b: (0,) * len(shape))

    q, k, v = pl.pallas_call(
        norm_qkv_kernel,
        out_shape=[jax.ShapeDtypeStruct((B, H, C), jnp.bfloat16)] * 3,
        grid=(B,),
        in_specs=[
            pl.BlockSpec((1, H, C), lambda b: (b, 0, 0)),    # x
            full1((1, C)), full1((1, C)),                    # gamma, beta
            full1((C, G)), full1((G, C)),                    # group reduce / expand
            full1((C, 3 * C)), full1((1, 3 * C)),            # fused Wqkv (bf16), bqkv
        ],
        out_specs=[pl.BlockSpec((1, H, C), lambda b: (b, 0, 0))] * 3,
        compiler_params=pltpu.CompilerParams(
            dimension_semantics=("parallel",),
            vmem_limit_bytes=VMEM_LIMIT_BYTES),
    )(x_t, gamma2, beta2, gred, gexp, wqkv, bqkv)

    tq = _pick_tile(H)
    tk = _pick_tile(H)
    nq, nk = H // tq, H // tk
    scale = float(C) ** -0.5

    kernel = functools.partial(flash_attn_kernel, scale=scale)
    full3 = lambda shape: pl.BlockSpec(shape, lambda b, qi, ki: (0,) * len(shape))

    out = pl.pallas_call(
        kernel,
        out_shape=jax.ShapeDtypeStruct((B, H, C), jnp.float32),
        grid=(B, nq, nk),
        in_specs=[
            pl.BlockSpec((1, tq, C), lambda b, qi, ki: (b, qi, 0)),   # x (residual)
            pl.BlockSpec((1, tq, C), lambda b, qi, ki: (b, qi, 0)),   # q (bf16)
            pl.BlockSpec((1, tk, C), lambda b, qi, ki: (b, ki, 0)),   # k (bf16)
            pl.BlockSpec((1, tk, C), lambda b, qi, ki: (b, ki, 0)),   # v (bf16)
            full3((C, C)),                                            # Wp^T (bf16)
            full3((1, C)),                                            # bp
        ],
        out_specs=pl.BlockSpec((1, tq, C), lambda b, qi, ki: (b, qi, 0)),
        scratch_shapes=[
            pltpu.VMEM((tq, 1), jnp.float32),    # running max
            pltpu.VMEM((tq, 1), jnp.float32),    # running denominator
            pltpu.VMEM((tq, C), jnp.float32),    # output accumulator
        ],
        compiler_params=pltpu.CompilerParams(
            dimension_semantics=("parallel", "parallel", "arbitrary"),
            vmem_limit_bytes=VMEM_LIMIT_BYTES),
    )(x_t, q, k, v, wp_t, bp2)

    return jnp.transpose(out, (0, 2, 1))                                     # back to (B, C, H)


# --------------------------------------------------------------------------------------
# Parameters (PyTorch convention) + pure-JAX reference for verification.
# --------------------------------------------------------------------------------------
def make_params(key, C):
    assert C % NUM_GROUPS == 0
    ks = jax.random.split(key, 10)
    gamma = 1.0 + 0.1 * jax.random.normal(ks[0], (C,), jnp.float32)
    beta = 0.1 * jax.random.normal(ks[1], (C,), jnp.float32)
    conv_w = lambda k: 0.05 * jax.random.normal(k, (C, C), jnp.float32)      # (out, in)
    conv_b = lambda k: 0.05 * jax.random.normal(k, (C,), jnp.float32)
    wq, bq = conv_w(ks[2]), conv_b(ks[3])
    wk, bk = conv_w(ks[4]), conv_b(ks[5])
    wv, bv = conv_w(ks[6]), conv_b(ks[7])
    wp, bp = conv_w(ks[8]), conv_b(ks[9])
    return (gamma, beta, wq, bq, wk, bk, wv, bv, wp, bp)


def reference(x_nch, params):
    """Pure-JAX f32 replica of the PyTorch forward."""
    gamma, beta, wq, bq, wk, bk, wv, bv, wp, bp = params
    B, C, H = x_nch.shape
    gs = C // NUM_GROUPS
    xg = x_nch.reshape(B, NUM_GROUPS, gs, H)
    mean = xg.mean(axis=(2, 3), keepdims=True)
    var = xg.var(axis=(2, 3), keepdims=True)
    hn = ((xg - mean) / jnp.sqrt(var + EPS)).reshape(B, C, H)
    hn = hn * gamma.reshape(1, C, 1) + beta.reshape(1, C, 1)

    conv = lambda w, b, h: jnp.einsum('oc,bch->boh', w, h) + b.reshape(1, C, 1)
    q = conv(wq, bq, hn)
    k = conv(wk, bk, hn)
    v = conv(wv, bv, hn)
    w_ = jnp.einsum('bci,bcj->bij', q, k) * (int(C) ** -0.5)
    w_ = jax.nn.softmax(w_, axis=2)
    h_ = jnp.einsum('bcj,bij->bci', v, w_)
    h_ = conv(wp, bp, h_)
    return x_nch + h_


if __name__ == "__main__":
    B, C, H = 2, 32, 16   # in_channels=32 so GroupNorm(32, C) is valid
    key = jax.random.PRNGKey(0)
    kx, kp = jax.random.split(key)
    x = jax.random.normal(kx, (B, C, H), jnp.float32)
    params = make_params(kp, C)

    out = jax.block_until_ready(attn_block(x, params))
    ref = reference(x, params)

    assert out.shape == (B, C, H)
    err = float(jnp.max(jnp.abs(out - ref)))
    # bf16 MXU operands + approx reciprocal -> relax tolerance vs the f32 reference.
    assert jnp.allclose(out, ref, atol=2e-2, rtol=2e-2), f"max abs diff {err}"
    print("KERNEL_OK")
</pallas_src>

<mosaic_0001>
module attributes {stable_mosaic.version = 11 : i64} {
  func.func @norm_qkv_kernel(%arg0: i32, %arg1: memref<1x16x32xf32, #tpu.memory_space<vmem>>, %arg2: memref<1x32xf32, #tpu.memory_space<vmem>>, %arg3: memref<1x32xf32, #tpu.memory_space<vmem>>, %arg4: memref<32x32xf32, #tpu.memory_space<vmem>>, %arg5: memref<32x32xf32, #tpu.memory_space<vmem>>, %arg6: memref<32x96xbf16, #tpu.memory_space<vmem>>, %arg7: memref<1x96xf32, #tpu.memory_space<vmem>>, %arg8: memref<1x16x32xbf16, #tpu.memory_space<vmem>>, %arg9: memref<1x16x32xbf16, #tpu.memory_space<vmem>>, %arg10: memref<1x16x32xbf16, #tpu.memory_space<vmem>>) attributes {dimension_semantics = [#tpu.dimension_semantics<parallel>], iteration_bounds = array<i64: 2>, scalar_prefetch = 0 : i64, scratch_operands = 0 : i64, tpu.core_type = #tpu.core_type<tc>, window_params = [{transform_indices = @transform_0, window_bounds = array<i64: 1, 16, 32>}, {pipeline_mode = #tpu.pipeline_mode<synchronous>, transform_indices = @transform_1, window_bounds = array<i64: 1, 32>}, {pipeline_mode = #tpu.pipeline_mode<synchronous>, transform_indices = @transform_2, window_bounds = array<i64: 1, 32>}, {pipeline_mode = #tpu.pipeline_mode<synchronous>, transform_indices = @transform_3, window_bounds = array<i64: 32, 32>}, {pipeline_mode = #tpu.pipeline_mode<synchronous>, transform_indices = @transform_4, window_bounds = array<i64: 32, 32>}, {pipeline_mode = #tpu.pipeline_mode<synchronous>, transform_indices = @transform_5, window_bounds = array<i64: 32, 96>}, {pipeline_mode = #tpu.pipeline_mode<synchronous>, transform_indices = @transform_6, window_bounds = array<i64: 1, 96>}, {transform_indices = @transform_7, window_bounds = array<i64: 1, 16, 32>}, {transform_indices = @transform_8, window_bounds = array<i64: 1, 16, 32>}, {transform_indices = @transform_9, window_bounds = array<i64: 1, 16, 32>}]} {
    %c0 = arith.constant 0 : index
    %c0_0 = arith.constant 0 : index
    %c0_1 = arith.constant 0 : index
    %0 = vector.load %arg1[%c0, %c0_0, %c0_1] : memref<1x16x32xf32, #tpu.memory_space<vmem>>, vector<1x16x32xf32>
    %1 = vector.shape_cast %0 : vector<1x16x32xf32> to vector<16x32xf32>
    %cst = arith.constant dense<0.000000e+00> : vector<32xf32>
    %2 = vector.multi_reduction <add>, %1, %cst [0] : vector<16x32xf32> to vector<32xf32>
    %3 = vector.shape_cast %2 : vector<32xf32> to vector<1x32xf32>
    %cst_2 = arith.constant 6.250000e-02 : f32
    %4 = vector.broadcast %cst_2 : f32 to vector<1x32xf32>
    %5 = arith.mulf %3, %4 : vector<1x32xf32>
    %c0_3 = arith.constant 0 : index
    %c0_4 = arith.constant 0 : index
    %6 = vector.load %arg4[%c0_3, %c0_4] : memref<32x32xf32, #tpu.memory_space<vmem>>, vector<32x32xf32>
    %cst_5 = arith.constant dense<0.000000e+00> : vector<1x32xf32>
    %7 = tpu.matmul %5, %6, %cst_5 {dimension_numbers = #tpu.dot_dimension_numbers<[1], [0], [0], [1], [0, 0, 1, 1], [], []>} : vector<1x32xf32>, vector<32x32xf32>, vector<1x32xf32> -> vector<1x32xf32>
    %c0_6 = arith.constant 0 : index
    %c0_7 = arith.constant 0 : index
    %8 = vector.load %arg5[%c0_6, %c0_7] : memref<32x32xf32, #tpu.memory_space<vmem>>, vector<32x32xf32>
    %cst_8 = arith.constant dense<0.000000e+00> : vector<1x32xf32>
    %9 = tpu.matmul %7, %8, %cst_8 {dimension_numbers = #tpu.dot_dimension_numbers<[1], [0], [0], [1], [0, 0, 1, 1], [], []>} : vector<1x32xf32>, vector<32x32xf32>, vector<1x32xf32> -> vector<1x32xf32>
    %10 = vector.broadcast %9 : vector<1x32xf32> to vector<16x32xf32>
    %11 = arith.subf %1, %10 : vector<16x32xf32>
    %12 = arith.mulf %11, %11 : vector<16x32xf32>
    %cst_9 = arith.constant dense<0.000000e+00> : vector<32xf32>
    %13 = vector.multi_reduction <add>, %12, %cst_9 [0] : vector<16x32xf32> to vector<32xf32>
    %14 = vector.shape_cast %13 : vector<32xf32> to vector<1x32xf32>
    %cst_10 = arith.constant 6.250000e-02 : f32
    %15 = vector.broadcast %cst_10 : f32 to vector<1x32xf32>
    %16 = arith.mulf %14, %15 : vector<1x32xf32>
    %c0_11 = arith.constant 0 : index
    %c0_12 = arith.constant 0 : index
    %17 = vector.load %arg4[%c0_11, %c0_12] : memref<32x32xf32, #tpu.memory_space<vmem>>, vector<32x32xf32>
    %cst_13 = arith.constant dense<0.000000e+00> : vector<1x32xf32>
    %18 = tpu.matmul %16, %17, %cst_13 {dimension_numbers = #tpu.dot_dimension_numbers<[1], [0], [0], [1], [0, 0, 1, 1], [], []>} : vector<1x32xf32>, vector<32x32xf32>, vector<1x32xf32> -> vector<1x32xf32>
    %c0_14 = arith.constant 0 : index
    %c0_15 = arith.constant 0 : index
    %19 = vector.load %arg5[%c0_14, %c0_15] : memref<32x32xf32, #tpu.memory_space<vmem>>, vector<32x32xf32>
    %cst_16 = arith.constant dense<0.000000e+00> : vector<1x32xf32>
    %20 = tpu.matmul %18, %19, %cst_16 {dimension_numbers = #tpu.dot_dimension_numbers<[1], [0], [0], [1], [0, 0, 1, 1], [], []>} : vector<1x32xf32>, vector<32x32xf32>, vector<1x32xf32> -> vector<1x32xf32>
    %cst_17 = arith.constant 9.99999997E-7 : f32
    %21 = vector.broadcast %cst_17 : f32 to vector<1x32xf32>
    %22 = arith.addf %20, %21 : vector<1x32xf32>
    %23 = math.rsqrt %22 : vector<1x32xf32>
    %24 = vector.broadcast %23 : vector<1x32xf32> to vector<16x32xf32>
    %25 = arith.mulf %11, %24 : vector<16x32xf32>
    %c0_18 = arith.constant 0 : index
    %c0_19 = arith.constant 0 : index
    %26 = vector.load %arg2[%c0_18, %c0_19] : memref<1x32xf32, #tpu.memory_space<vmem>>, vector<1x32xf32>
    %27 = vector.broadcast %26 : vector<1x32xf32> to vector<16x32xf32>
    %28 = arith.mulf %25, %27 : vector<16x32xf32>
    %c0_20 = arith.constant 0 : index
    %c0_21 = arith.constant 0 : index
    %29 = vector.load %arg3[%c0_20, %c0_21] : memref<1x32xf32, #tpu.memory_space<vmem>>, vector<1x32xf32>
    %30 = vector.broadcast %29 : vector<1x32xf32> to vector<16x32xf32>
    %31 = arith.addf %28, %30 : vector<16x32xf32>
    %32 = arith.truncf %31 : vector<16x32xf32> to vector<16x32xbf16>
    %c0_22 = arith.constant 0 : index
    %c0_23 = arith.constant 0 : index
    %33 = vector.load %arg6[%c0_22, %c0_23] : memref<32x96xbf16, #tpu.memory_space<vmem>>, vector<32x96xbf16>
    %cst_24 = arith.constant dense<0.000000e+00> : vector<16x96xf32>
    %34 = tpu.matmul %32, %33, %cst_24 {dimension_numbers = #tpu.dot_dimension_numbers<[1], [0], [0], [1], [0, 0, 1, 1], [], []>} : vector<16x32xbf16>, vector<32x96xbf16>, vector<16x96xf32> -> vector<16x96xf32>
    %c0_25 = arith.constant 0 : index
    %c0_26 = arith.constant 0 : index
    %35 = vector.load %arg7[%c0_25, %c0_26] : memref<1x96xf32, #tpu.memory_space<vmem>>, vector<1x96xf32>
    %36 = vector.broadcast %35 : vector<1x96xf32> to vector<16x96xf32>
    %37 = arith.addf %34, %36 : vector<16x96xf32>
    %38 = vector.extract_strided_slice %37 {offsets = [0, 0], sizes = [16, 32], strides = [1, 1]} : vector<16x96xf32> to vector<16x32xf32>
    %39 = arith.truncf %38 : vector<16x32xf32> to vector<16x32xbf16>
    %c0_27 = arith.constant 0 : index
    %c0_28 = arith.constant 0 : index
    %c0_29 = arith.constant 0 : index
    %40 = vector.load %arg8[%c0_27, %c0_28, %c0_29] : memref<1x16x32xbf16, #tpu.memory_space<vmem>>, vector<1x16x32xbf16>
    %41 = vector.shape_cast %40 : vector<1x16x32xbf16> to vector<16x32xbf16>
    %42 = vector.shape_cast %39 : vector<16x32xbf16> to vector<1x16x32xbf16>
    tpu.vector_store %arg8[%c0_27, %c0_28, %c0_29], %42 {strides = array<i32>} : memref<1x16x32xbf16, #tpu.memory_space<vmem>>, vector<1x16x32xbf16>,
    %43 = vector.extract_strided_slice %37 {offsets = [0, 32], sizes = [16, 32], strides = [1, 1]} : vector<16x96xf32> to vector<16x32xf32>
    %44 = arith.truncf %43 : vector<16x32xf32> to vector<16x32xbf16>
    %c0_30 = arith.constant 0 : index
    %c0_31 = arith.constant 0 : index
    %c0_32 = arith.constant 0 : index
    %45 = vector.load %arg9[%c0_30, %c0_31, %c0_32] : memref<1x16x32xbf16, #tpu.memory_space<vmem>>, vector<1x16x32xbf16>
    %46 = vector.shape_cast %45 : vector<1x16x32xbf16> to vector<16x32xbf16>
    %47 = vector.shape_cast %44 : vector<16x32xbf16> to vector<1x16x32xbf16>
    tpu.vector_store %arg9[%c0_30, %c0_31, %c0_32], %47 {strides = array<i32>} : memref<1x16x32xbf16, #tpu.memory_space<vmem>>, vector<1x16x32xbf16>,
    %48 = vector.extract_strided_slice %37 {offsets = [0, 64], sizes = [16, 32], strides = [1, 1]} : vector<16x96xf32> to vector<16x32xf32>
    %49 = arith.truncf %48 : vector<16x32xf32> to vector<16x32xbf16>
    %c0_33 = arith.constant 0 : index
    %c0_34 = arith.constant 0 : index
    %c0_35 = arith.constant 0 : index
    %50 = vector.load %arg10[%c0_33, %c0_34, %c0_35] : memref<1x16x32xbf16, #tpu.memory_space<vmem>>, vector<1x16x32xbf16>
    %51 = vector.shape_cast %50 : vector<1x16x32xbf16> to vector<16x32xbf16>
    %52 = vector.shape_cast %49 : vector<16x32xbf16> to vector<1x16x32xbf16>
    tpu.vector_store %arg10[%c0_33, %c0_34, %c0_35], %52 {strides = array<i32>} : memref<1x16x32xbf16, #tpu.memory_space<vmem>>, vector<1x16x32xbf16>,
    return
  }
  func.func @transform_0(%arg0: i32) -> (i32, i32, i32) {
    %c0_i32 = arith.constant 0 : i32
    %c0_i32_0 = arith.constant 0 : i32
    %c0_i32_1 = arith.constant 0 : i32
    return %arg0, %c0_i32, %c0_i32_0 : i32, i32, i32
  }
  func.func @transform_1(%arg0: i32) -> (i32, i32) {
    %c0_i32 = arith.constant 0 : i32
    %c0_i32_0 = arith.constant 0 : i32
    %c0_i32_1 = arith.constant 0 : i32
    return %c0_i32, %c0_i32_0 : i32, i32
  }
  func.func @transform_2(%arg0: i32) -> (i32, i32) {
    %c0_i32 = arith.constant 0 : i32
    %c0_i32_0 = arith.constant 0 : i32
    %c0_i32_1 = arith.constant 0 : i32
    return %c0_i32, %c0_i32_0 : i32, i32
  }
  func.func @transform_3(%arg0: i32) -> (i32, i32) {
    %c0_i32 = arith.constant 0 : i32
    %c0_i32_0 = arith.constant 0 : i32
    %c0_i32_1 = arith.constant 0 : i32
    return %c0_i32, %c0_i32_0 : i32, i32
  }
  func.func @transform_4(%arg0: i32) -> (i32, i32) {
    %c0_i32 = arith.constant 0 : i32
    %c0_i32_0 = arith.constant 0 : i32
    %c0_i32_1 = arith.constant 0 : i32
    return %c0_i32, %c0_i32_0 : i32, i32
  }
  func.func @transform_5(%arg0: i32) -> (i32, i32) {
    %c0_i32 = arith.constant 0 : i32
    %c0_i32_0 = arith.constant 0 : i32
    %c0_i32_1 = arith.constant 0 : i32
    return %c0_i32, %c0_i32_0 : i32, i32
  }
  func.func @transform_6(%arg0: i32) -> (i32, i32) {
    %c0_i32 = arith.constant 0 : i32
    %c0_i32_0 = arith.constant 0 : i32
    %c0_i32_1 = arith.constant 0 : i32
    return %c0_i32, %c0_i32_0 : i32, i32
  }
  func.func @transform_7(%arg0: i32) -> (i32, i32, i32) {
    %c0_i32 = arith.constant 0 : i32
    %c0_i32_0 = arith.constant 0 : i32
    %c0_i32_1 = arith.constant 0 : i32
    return %arg0, %c0_i32, %c0_i32_0 : i32, i32, i32
  }
  func.func @transform_8(%arg0: i32) -> (i32, i32, i32) {
    %c0_i32 = arith.constant 0 : i32
    %c0_i32_0 = arith.constant 0 : i32
    %c0_i32_1 = arith.constant 0 : i32
    return %arg0, %c0_i32, %c0_i32_0 : i32, i32, i32
  }
  func.func @transform_9(%arg0: i32) -> (i32, i32, i32) {
    %c0_i32 = arith.constant 0 : i32
    %c0_i32_0 = arith.constant 0 : i32
    %c0_i32_1 = arith.constant 0 : i32
    return %arg0, %c0_i32, %c0_i32_0 : i32, i32, i32
  }
}

</mosaic_0001>

<bundles_post_ra>
// kernel: tpu_custom_call.1
= control target key start
LH: loop header
LB: loop body
LE: loop exit
PB: predicated region body
PF: predicated region fallthrough
CT: control target
= control target key end

     0   :  { %s1947_s0 = inlined_call_operand.hbm [shape: f32[2,16,32], index: 0, kind: input, shape index: {}]   ;;  %s1948_s1 = inlined_call_operand.vmem [shape: f32[1,32], index: 1, kind: input, shape index: {}]   ;;  %s1949_s2 = inlined_call_operand.vmem [shape: f32[1,32], index: 2, kind: input, shape index: {}]   ;;  %s1950_s3 = inlined_call_operand.hbm [shape: f32[32,32], index: 3, kind: input, shape index: {}]   ;;  %s1951_s4 = inlined_call_operand.hbm [shape: f32[32,32], index: 4, kind: input, shape index: {}]   ;;  %s1952_s5 = inlined_call_operand.vmem [shape: bf16[32,96], index: 5, kind: input, shape index: {}]   ;;  %s1953_s6 = inlined_call_operand.vmem [shape: f32[1,96], index: 6, kind: input, shape index: {}]   ;;  %s1954_s7 = inlined_call_operand.hbm [shape: bf16[2,16,32], index: 7, kind: output, shape index: {0}]   ;;  %s1955_s8 = inlined_call_operand.hbm [shape: bf16[2,16,32], index: 8, kind: output, shape index: {1}]   ;;  %s1956_s9 = inlined_call_operand.hbm [shape: bf16[2,16,32], index: 9, kind: output, shape index: {2}]  }
   0x1   :  { %1969 = sst [smem:[#allocation17_spill]] %s1947_s0 }
   0x2   :  { %1970 = sst [smem:[#allocation18_spill]] %s1948_s1 }
   0x3   :  { %15 = vsyncpa [#allocation3], 0 }
   0x4   :  { %17 = vsyncpa [#allocation3 + $0x1], 0 }
   0x5   :  { %18 = vsyncpa [#allocation6], 0 }
   0x6   :  { %19 = vsyncpa [#allocation4], 0 }
   0x7   :  { %21 = vsyncpa [#allocation4 + $0x1], 0 }
   0x8   :  { %22 = vsyncpa [#allocation10], 0 }
   0x9   :  { %24 = vsyncpa [#allocation10 + $0x1], 0  ;;  %s1573_s30 = smov 0   ;;  %s1575_s10 = smov 0  }
   0xa   :  { %s1577_s11 = smov 0   ;;  %s1579_s12 = smov 0  }
   0xb LB: > { %s1594_s13 = sadd.s32 4294967295, %s1507_s12   ;;  %s1958_s14 = sadd.s32 4294967294, %s1507_s12   ;;  %s1507_s12 = sphi %s1579_s12, %s1998_s12   ;;  %s1503_s11 = sphi %s1577_s11, %s1997_s11   ;;  %s1499_s10 = sphi %s1575_s10, %s1996_s10   ;;  %s1495_s30 = sphi %s1573_s30, %s1995_s30  }
   0xc   : > { %p50_p0 = scmp.ne.s32.totalorder %s1499_s10, %s1495_s30  ;;  %p1957_p1 = scmp.eq.s32.totalorder %s1594_s13, 0 }
   0xd   : > { %p206_p3 = scmp.eq.s32.totalorder %s1958_s14, 1  ;;  %p1060_p5 = scmp.ge.s32.totalorder %s1507_s12, 1 }
   0xe   : > { %p1605_p4 = por %p1957_p1, %p50_p0  ;;  %p265_p7 = scmp.lt.s32.totalorder %s1507_s12, 3 }
   0xf   : > { %p1610_p6 = por %p206_p3, %p50_p0  ;;  %s1509_s18 = smov [#allocation5]  }
  0x10   : > { %s1971_s15 = scalar_select %p1605_p4, 1, 0 }
  0x11   : > { %s1972_s16 = scalar_select %p1610_p6, 1, 0 }
  0x12   : > { %p1615_p8 = pnand %p1060_p5, %p265_p7  ;;  %s283_s19 = sshll.u32 %s1509_s18, 4  ;;  %s1619_s19 = int_to_ptr.vmem [resolvable:$true] %s283_s19 }
  0x13   : > { %1973 = sst [smem:[#allocation16_spill]] %s1972_s16  ;;  %s1510_s21 = smov [#allocation7]  }
  0x14   : > { %p1218_p9 = pneg %p1615_p8  ;;  %s296_s22 = sshll.u32 %s1510_s21, 4  ;;  %s1630_s22 = int_to_ptr.vmem [resolvable:$true] %s296_s22 }
  0x15   : > { %s1291_s25 = scalar_lea.hbm %s1950_s3, 512 }
  0x16   : > { %p1626_p11 = pnand %p1218_p9, %p1957_p1  ;;  %p1292_p12 = scmp.ne.s32.totalorder %s1950_s3, %s1291_s25 }
  0x17   : > { %p1298_p5 = scmp.lt.u32.totalorder %s1291_s25, %s1950_s3 }
  0x18   : > { %p1293_p13 = pneg %p1626_p11 }
  0x1a   : > { %p1294_p0 = pnand %p1293_p13, %p1292_p12 }
  0x1c   : > { %p1295_p3 = pneg %p1294_p0 }
  0x1e   : > { %p1300_p7 = pnand %p1298_p5, %p1295_p3 }
  0x20   : > { %1303 = shalt.err (!%p1300_p7)
}
  0x21   : > { %s1304_s18 = scalar_lea.vmem %s1619_s19, 512  ;;  %p1312_p2 = scmp.lt.s32.totalorder %s1619_s19, %s1619_s19 }
  0x22   : > { %p1305_p9 = scmp.ne.s32.totalorder %s1619_s19, %s1304_s18  ;;  %p1313_p12 = scmp.lt.s32.totalorder %s1304_s18, %s1304_s18 }
  0x24   : > { %p1307_p10 = pnand %p1305_p9, %p1293_p13  ;;  %p1314_p0 = por %p1313_p12, %p1312_p2 }
  0x26   : > { %p1308_p1 = pneg %p1307_p10 }
  0x28   : > { %p1315_p6 = pnand %p1314_p0, %p1308_p1 }
  0x2a   : > { %1318 = shalt.err (!%p1315_p6)
}
  0x2b   : > { %s1960_s21 = smov 128   ;;  %s1961_s23 = smov 8  }
  0x2c   : > { %1221 = dma.hbm_to_vmem [thread:$0]  (!%p1626_p11), %s1950_s3, 512, %s1619_s19, [#allocation6], %s1960_s21, %s1960_s21, %s1961_s23  }
  0x2d   : > { %s1319_s28 = scalar_lea.hbm %s1951_s4, 512 }
  0x2e   : > { %p1320_p1 = scmp.ne.s32.totalorder %s1951_s4, %s1319_s28  ;;  %p1326_p10 = scmp.lt.u32.totalorder %s1319_s28, %s1951_s4 }
  0x30   : > { %p1322_p2 = pnand %p1320_p1, %p1293_p13 }
  0x32   : > { %p1323_p6 = pneg %p1322_p2 }
  0x34   : > { %p1328_p3 = pnand %p1326_p10, %p1323_p6 }
  0x36   : > { %1331 = shalt.err (!%p1328_p3)
}
  0x37   : > { %s1332_s19 = scalar_lea.vmem %s1630_s22, 512  ;;  %p1340_p12 = scmp.lt.s32.totalorder %s1630_s22, %s1630_s22 }
  0x38   : > { %p1333_p5 = scmp.ne.s32.totalorder %s1630_s22, %s1332_s19  ;;  %p1341_p0 = scmp.lt.s32.totalorder %s1332_s19, %s1332_s19 }
  0x3a   : > { %p1335_p7 = pnand %p1333_p5, %p1293_p13  ;;  %p1342_p1 = por %p1341_p0, %p1340_p12 }
  0x3c   : > { %p1336_p9 = pneg %p1335_p7 }
  0x3e   : > { %p1343_p2 = pnand %p1342_p1, %p1336_p9 }
  0x40   : > { %1346 = shalt.err (!%p1343_p2)
}
  0x41   : > { %1224 = dma.hbm_to_vmem [thread:$0]  (!%p1626_p11), %s1951_s4, 512, %s1630_s22, [#allocation6], %s1960_s21, %s1960_s21, %s1961_s23  }
  0x42   : > { %s1691_s20 = sadd.s32 1, %s1507_s12   ;;  %s37_s24 = sadd.s32 1, %s1503_s11 }
  0x43   : > { %s34_s25 = ssub.s32 %s1507_s12, %s1691_s20  ;;  %p44_p13 = scmp.ne.s32.totalorder %s1503_s11, %s1499_s10 }
  0x44   : > { %p35_p6 = scmp.eq.s32.totalorder %s34_s25, 0  ;;  %p45_p10 = scmp.eq.s32.totalorder %s1507_s12, 0 }
  0x45   : > { %p1976_p3 = scmp.eq.s32.totalorder %s1594_s13, 1  ;;  %p1241_p7 = scmp.lt.s32.totalorder %s1507_s12, 2 }
  0x46   : > { %s1707_s27 = scalar_select %p35_p6, %s1503_s11, %s37_s24  }
  0x47   : > { %p1701_p5 = por %p1976_p3, %p44_p13  ;;  %p46_p9 = por %p45_p10, %p44_p13 }
  0x48   : > { %s316_s28 = sand.u32 1, %s1503_s11   ;;  %s1097_s22 = sshll.u32 %s1507_s12, 8 }
  0x49   : > { %s1977_s26 = scalar_select %p1701_p5, 1, 0 }
  0x4a   : > { %s1064_s29 = sshll.u32 %s316_s28, 4  ;;  %s1978_s0 = sld [smem:[#allocation17_spill]] }
  0x4b   : > { %s320_s16 = scalar_lea.vmem [#allocation2], %s1064_s29  ;;  %p1718_p11 = pnand %p1241_p7, %p46_p9 }
  0x4c   : > { %s327_s25 = sshll.u32 %s320_s16, 4  ;;  %s1722_s21 = scalar_lea.sflag [#allocation3], %s316_s28  ;;  %s1716_s25 = int_to_ptr.vmem [resolvable:$true] %s327_s25 }
  0x4d   : > { %p1349_p0 = pneg %p1718_p11 }
  0x50   : > { %s1714_s14 = scalar_lea.hbm %s1978_s0, %s1097_s22  ;;  %s1352_s18 = scalar_lea.hbm %s1978_s0, 512 }
  0x51   : > { %s1347_s23 = scalar_lea.hbm %s1714_s14, 256  ;;  %p1353_p13 = scmp.lt.u32.totalorder %s1714_s14, %s1978_s0 }
  0x52   : > { %p1348_p12 = scmp.ne.s32.totalorder %s1714_s14, %s1347_s23  ;;  %p1354_p6 = scmp.lt.u32.totalorder %s1352_s18, %s1347_s23 }
  0x53   : > { %p1356_p3 = scmp.lt.u32.totalorder %s1347_s23, %s1714_s14 }
  0x54   : > { %p1350_p1 = pnand %p1349_p0, %p1348_p12  ;;  %p1355_p10 = por %p1354_p6, %p1353_p13 }
  0x56   : > { %p1351_p2 = pneg %p1350_p1  ;;  %p1357_p7 = por %p1356_p3, %p1355_p10 }
  0x58   : > { %p1358_p9 = pnand %p1357_p7, %p1351_p2 }
  0x5a   : > { %1361 = shalt.err (!%p1358_p9)
}
  0x5b   : > { %s1362_s28 = scalar_lea.vmem %s1716_s25, 256  ;;  %s1513_s29 = smov [#allocation2]  }
  0x5c   : > { %p1363_p12 = scmp.ne.s32.totalorder %s1716_s25, %s1362_s28  ;;  %s1367_s22 = sshll.u32 %s1513_s29, 4  ;;  %s1368_s22 = int_to_ptr.vmem [resolvable:$false] %s1367_s22 }
  0x5d   : > { %s1369_s19 = scalar_lea.vmem %s1368_s22, 512  ;;  %p1370_p4 = scmp.lt.s32.totalorder %s1716_s25, %s1368_s22 }
  0x5e   : > { %p1365_p1 = pnand %p1363_p12, %p1349_p0  ;;  %p1371_p13 = scmp.lt.s32.totalorder %s1369_s19, %s1362_s28 }
  0x60   : > { %p1366_p5 = pneg %p1365_p1  ;;  %p1372_p6 = por %p1371_p13, %p1370_p4 }
  0x62   : > { %p1373_p10 = pnand %p1372_p6, %p1366_p5 }
  0x64   : > { %1376 = shalt.err (!%p1373_p10)
}
  0x65   : > { %s1980_s23 = smov 8   ;;  %s1981_s18 = smov 128  }
  0x66   : > { %1228 = dma.hbm_to_vmem [thread:$0]  (!%p1718_p11), %s1714_s14, 256, %s1716_s25, %s1722_s21, %s1981_s18, %s1981_s18, %s1980_s23  }
  0x67   : > { %339 = sbr.rel (%p1615_p8) target bundleno = 1419 (0x58b), region = 48  ;;  %s1756_s16 = sand.u32 (!%p1615_p8), 1, %s1499_s10  }
  0x68   : > { %s1068_s28 = sshll.u32 (!%p1615_p8), %s1756_s16, 4  ;;  %s342_s29 = scalar_lea.sflag (!%p1615_p8), [#allocation3], %s1756_s16 }
  0x69   : > { %s345_s22 = scalar_lea.vmem (!%p1615_p8), [#allocation2], %s1068_s28  ;;  %p1982_p4 = scmp.ne.s32.totalorder (!%p1615_p8), %s1971_s15, 0 }
  0x6e   : > { %1478 = dma.done.wait (%p1982_p4), %s342_s29, 256  }
  0x6f   : > { %1480 = vsyncadd (%p1982_p4), %s342_s29, 4294967040  ;;  %p1983_p5 = scmp.eq.s32.totalorder %s1594_s13, 0 }
  0x71   : > { %1482 = dma.done.wait (%p1983_p5), [#allocation6], 1024   ;;  %p1984_p11 = pmov %p1983_p5 }
  0x72   : > { %v1514_v0 = vmov 0.0|0.0   ;;  %vm1515_vm0 = vmmov 0   ;;  %v1516_v1 = vmov 0.0   ;;  %vm401_vm1 = vcmask 261120   ;;  %v412_v2 = vld [vmem:[#allocation5] sm:$0xff]  ;;  %v413_v3 = vld [vmem:[#allocation5 + $0x8] sm:$0xff] }
  0x73   : > { %1484 = vsyncadd (%p1984_p11), [#allocation6], 4294966272  ;;  %1178 = vmatprep.subr.bf16.mxu1 %v1514_v0  ;;  %1134 = vmatprep.mubr.msk.f32.mxu1 %vm1515_vm0, %v1516_v1  ;;  %v414_v4 = vld [vmem:[#allocation5 + $0x10] sm:$0xff]  ;;  %v1179_v5 = vpack.c.bf16 %v413_v3, %v412_v2  ;;  %v415_v6 = vld [vmem:[#allocation5 + $0x18] sm:$0xff]  ;;  %v566_v28 = vlaneseq  ;;  %s1985_s1 = sld [smem:[#allocation18_spill]]  ;;  %s1802_s18 = sshll.u32 %s1756_s16, 3 }
  0x74   : > { %1190 = vmatprep.subr.bf16.mxu0 %v1514_v0  ;;  %1156 = vmatprep.mubr.msk.f32.mxu0 %vm1515_vm0, %v1516_v1  ;;  %v399_v7 = vld [vmem:[%s345_s22] sm:$0xff]  ;;  %v400_v8 = vld [vmem:[%s345_s22 + $0x8] sm:$0xff]  ;;  %v1182_v11 = vpack.c.bf16 %v415_v6, %v414_v4  ;;  %vm831_vm2 = vcmask 257024   ;;  %s383_s22 = scalar_lea.vmem [#allocation8], %s1802_s18  ;;  %s1809_s17 = sshll.u32 %s1594_s13, 7 }
  0x75   : > { %v402_v9 = vsel %vm401_vm1, %v399_v7, 0.0  ;;  %v403_v10 = vsel %vm401_vm1, %v400_v8, 0.0  ;;  %1180 = vmatpush3.bf16.msra.mxu1 %v1179_v5  ;;  %1192 = vmatpush3.bf16.msra.mxu0 %v1179_v5  ;;  %v489_v18 = vld [vmem:[#allocation7] sm:$0xff]  ;;  %v490_v19 = vld [vmem:[#allocation7 + $0x8] sm:$0xff]  ;;  %v491_v23 = vld [vmem:[#allocation7 + $0x10] sm:$0xff]  ;;  %v567_v29 = vshrl.u32 %v566_v28, 7  ;;  %s1818_s19 = scalar_lea.hbm %s1954_s7, %s1809_s17 }
  0x76   : > { %v404_v12 = vadd.f32 %v403_v10, %v402_v9  ;;  %1181 = vmatprep.subr.bf16.mxu1 %v1514_v0  ;;  %1193 = vmatprep.subr.bf16.mxu0 %v1514_v0  ;;  %v1185_v21 = vpack.c.bf16 %v490_v19, %v489_v18  ;;  %v492_v24 = vld [vmem:[#allocation7 + $0x18] sm:$0xff]  ;;  %v1287_v50 = vld [vmem:[%s1952_s5] sm:$0xff]   ;;  %v1288_v51 = vld [vmem:[%s1952_s5 + $0x8] sm:$0xff]   ;;  %s874_s15 = sshll.u32 %s383_s22, 4  ;;  %s1965_s21 = smov 64   ;;  %s1820_s15 = int_to_ptr.vmem [resolvable:$true] %s874_s15 }
  0x77   : > { %v1188_v25 = vpack.c.bf16 %v492_v24, %v491_v23  ;;  %v568_v30 = vsub.s32 0, %v567_v29  ;;  %v1079_v60 = vld [vmem:[%s1949_s2] ss:$0 sm:$0xff]  ;;  %s1964_s14 = smov 96   ;;  %s1377_s28 = scalar_lea.vmem %s1820_s15, 128 }
  0x78   : > { %v405_v13 = vrot.slane %v404_v12, 4  ;;  %v1080_v2 = vld [vmem:[%s1953_s6] ss:$0 sm:$0xff]  ;;  %p1378_p8 = scmp.ne.s32.totalorder %s1820_s15, %s1377_s28  ;;  %p1986_p0 = scmp.ne.s32.totalorder %s1977_s26, 0 }
  0x79   : > { %1183 = vmatpush3.bf16.msra.mxu1 %v1182_v11  ;;  %1195 = vmatpush3.bf16.msra.mxu0 %v1182_v11  ;;  %v1078_v57 = vld [vmem:[%s1985_s1] ss:$0 sm:$0xff]  ;;  %s1519_s29 = smov [#allocation8]  }
  0x7a   : > { %v406_v14 = vadd.f32 %v405_v13, %v404_v12  ;;  %1184 = vmatprep.subr.bf16.mxu1 %v1514_v0  ;;  %1170 = vmatprep.subr.bf16.mxu0 %v1516_v1  ;;  %p1379_p2 = pnand %p1378_p8, %p1986_p0 }
  0x7c   : > { %v407_v15 = vrot.slane %v406_v14, 2  ;;  %p1380_p3 = pneg %p1379_p2 }
  0x7e   : > { %v408_v16 = vadd.f32 %v407_v15, %v406_v14 }
  0x80   : > { %v409_v17 = vrot.slane %v408_v16, 1 }
  0x82   : > { %v410_v20 = vadd.f32 %v409_v17, %v408_v16 }
  0x84   : > { %v411_v22 = vmul.f32 0.0625, %v410_v20 }
  0x86   : > { %1135 = vmatmul.mubr.msk.f32.vlgmr.msra.gmra.mrb[0].mxu1 %vm401_vm1, %v411_v22 }
  0x87   : > { %1186 = vmatpush3.bf16.msra.mxu1 %v1185_v21  ;;  %1145 = vmatprep.mubr.msk.f32.mxu1 %vm1515_vm0, %v1516_v1 }
  0x88   : > { %1187 = vmatprep.subr.bf16.mxu1 %v1514_v0 }
  0x8b   : > { %1189 = vmatpush3.bf16.msra.mxu1 %v1188_v25 }
  0x8c   : > { %1196 = vmatprep.subr.bf16.mxu1 %v1514_v0 }
 0x159   : > { %v485_v26 = vpop.f32.mrb[0].mxu1 }
 0x15a   : > { %v1136_v27 = vpop.f32.mrb[1].mxu1  ;;  %1146 = vmatmul.mubr.msk.f32.vlgmr.msra.gmra.mrb[2].mxu1 %vm401_vm1, %v485_v26 }
 0x15b   : > { %1198 = vmatpush3.bf16.msra.mxu1 %v1185_v21  ;;  %1167 = vmatprep.mubr.msk.f32.mxu1 %vm1515_vm0, %v1516_v1 }
 0x15c   : > { %1199 = vmatprep.subr.bf16.mxu1 %v1514_v0 }
 0x15f   : > { %1201 = vmatpush3.bf16.msra.mxu1 %v1188_v25 }
 0x22d   : > { %v562_v31 = vpop.f32.mrb[2].mxu1 }
 0x22e   : > { %v569_v32 = vrot.slane %v562_v31, %v568_v30  ;;  %v1147_v33 = vpop.f32.mrb[3].mxu1 }
 0x230   : > { %v570_v34 = vsub.f32 %v399_v7, %v569_v32  ;;  %v571_v35 = vsub.f32 %v400_v8, %v569_v32 }
 0x232   : > { %v572_v36 = vmul.f32 %v570_v34, %v570_v34  ;;  %v573_v37 = vmul.f32 %v571_v35, %v571_v35 }
 0x234   : > { %v574_v38 = vsel %vm401_vm1, %v572_v36, 0.0  ;;  %v575_v39 = vsel %vm401_vm1, %v573_v37, 0.0 }
 0x235   : > { %v576_v40 = vadd.f32 %v575_v39, %v574_v38 }
 0x237   : > { %v577_v41 = vrot.slane %v576_v40, 4 }
 0x239   : > { %v578_v42 = vadd.f32 %v577_v41, %v576_v40 }
 0x23b   : > { %v579_v43 = vrot.slane %v578_v42, 2 }
 0x23d   : > { %v580_v44 = vadd.f32 %v579_v43, %v578_v42 }
 0x23f   : > { %v581_v45 = vrot.slane %v580_v44, 1 }
 0x241   : > { %v582_v46 = vadd.f32 %v581_v45, %v580_v44 }
 0x243   : > { %v583_v47 = vmul.f32 0.0625, %v582_v46 }
 0x245   : > { %1157 = vmatmul.mubr.msk.f32.vlgmr.msra.gmra.mrb[0].mxu0 %vm401_vm1, %v583_v47 }
 0x246   : > { %1174 = vmatprep.mubr.msk.bf16.mxu0 %vm1515_vm0, %v1516_v1  ;;  %1171 = vmatpush3.bf16.msra.mxu0 %v1287_v50 }
 0x247   : > { %1172 = vmatprep.subr.bf16.mxu0 %v1516_v1 }
 0x24a   : > { %1173 = vmatpush3.bf16.msra.mxu0 %v1288_v51 }
 0x318   : > { %v653_v48 = vpop.f32.mrb[0].mxu0 }
 0x319   : > { %v1158_v49 = vpop.f32.mrb[1].mxu0  ;;  %1168 = vmatmul.mubr.msk.f32.vlgmr.msra.gmra.mrb[4].mxu1 %vm401_vm1, %v653_v48 }
 0x3ec   : > { %v726_v52 = vpop.f32.mrb[4].mxu1 }
 0x3ed   : > { %v727_v53 = vadd.f32 1e-06, %v726_v52  ;;  %v1169_v54 = vpop.f32.mrb[5].mxu1 }
 0x3ef   : > { %1289 = vrsqrt.f32 %v727_v53 }
 0x3f9   : > { %v1290_v55 = vpop.eup %1289 }
 0x3fa   : > { %v734_v56 = vrot.slane %v1290_v55, %v568_v30 }
 0x3fc   : > { %v735_v58 = vmul.f32 %v734_v56, %v570_v34  ;;  %v736_v59 = vmul.f32 %v734_v56, %v571_v35 }
 0x3fe   : > { %v744_v61 = vmul.f32 %v1078_v57, %v735_v58  ;;  %v745_v62 = vmul.f32 %v1078_v57, %v736_v59 }
 0x400   : > { %v753_v63 = vadd.f32 %v1079_v60, %v744_v61  ;;  %v754_v0 = vadd.f32 %v1079_v60, %v745_v62 }
 0x402   : > { %v755_v1 = vpack.c.bf16 %v754_v0, %v753_v63 }
 0x404   : > { %1175 = vmatmul.mubr.msk.bf16.vlgmr.msra.gmra.mrb[4].mxu0 %vm401_vm1, %v755_v1 }
 0x4d7   : > { %v816_v3 = vpop.f32.mrb[4].mxu0 }
 0x4d8   : > { %v817_v4 = vadd.f32 %v1080_v2, %v816_v3  ;;  %v1176_v5 = vpop.f32.mrb[5].mxu0 }
 0x4d9   : > { %v819_v6 = vpop.f32.mrb[6].mxu0 }
 0x4da   : > { %v1098_v7 = vpack.c.bf16 %v817_v4, %v817_v4  ;;  %v820_v8 = vadd.f32 %v1080_v2, %v819_v6  ;;  %v1177_v9 = vpop.f32.mrb[7].mxu0 }
 0x4dc   : > { %832 = vst.msk [vmem:[%s383_s22] sm:$0xf] %vm831_vm2, %v1098_v7  ;;  %v1099_v10 = vpack.c.bf16 %v820_v8, %v820_v8  ;;  %842 = vrot.lane.b32.xlu1 %v1098_v7, %s1965_s21  ;;  %834 = vrot.lane.b32.xlu0 %v1098_v7, %s1964_s14  ;;  %s1381_s14 = sshll.u32 %s1519_s29, 4  ;;  %s1382_s14 = int_to_ptr.vmem [resolvable:$false] %s1381_s14 }
 0x4dd   : > { %s1383_s21 = scalar_lea.vmem %s1382_s14, 256  ;;  %p1384_p7 = scmp.lt.s32.totalorder %s1820_s15, %s1382_s14 }
 0x4de   : > { %833 = vst.msk [vmem:[%s383_s22 + $0x4] sm:$0xf] %vm831_vm2, %v1099_v10  ;;  %p1385_p9 = scmp.lt.s32.totalorder %s1383_s21, %s1377_s28 }
 0x4e0   : > { %p1386_p12 = por %p1385_p9, %p1384_p7 }
 0x4e2   : > { %p1387_p1 = pnand %p1386_p12, %p1380_p3 }
 0x4e4   : > { %1390 = shalt.err (!%p1387_p1)
}
 0x4e5   : > { %s1391_s22 = scalar_lea.hbm %s1818_s19, 128  ;;  %s1395_s29 = scalar_lea.hbm %s1954_s7, 256 }
 0x4e6   : > { %p1392_p13 = scmp.ne.s32.totalorder %s1818_s19, %s1391_s22  ;;  %p1396_p4 = scmp.lt.u32.totalorder %s1818_s19, %s1954_s7 }
 0x4e7   : > { %p1397_p5 = scmp.lt.u32.totalorder %s1395_s29, %s1391_s22  ;;  %p1399_p8 = scmp.lt.u32.totalorder %s1391_s22, %s1818_s19 }
 0x4e8   : > { %p1393_p6 = pnand %p1392_p13, %p1986_p0 }
 0x4e9   : > { %p1398_p11 = por %p1397_p5, %p1396_p4 }
 0x4ea   : > { %p1394_p10 = pneg %p1393_p6 }
 0x4eb   : > { %p1400_p2 = por %p1399_p8, %p1398_p11 }
 0x4ed   : > { %p1401_p3 = pnand %p1400_p2, %p1394_p10 }
 0x4ef   : > { %1404 = shalt.err (!%p1401_p3)
}
 0x4f0   : > { %s1967_s21 = smov 4   ;;  %s1987_s28 = smov 64  }
 0x4f1   : > { %s1988_s0 = scalar_lea.sflag [#allocation4], %s1756_s16  ;;  %844 = vrot.lane.b32.xlu1 %v1099_v10, %s1987_s28  ;;  %s1989_s23 = smov 96  }
 0x4f2   : > { %1212 = dma.vmem_to_hbm [thread:$0]  (%p1986_p0), %s1820_s15, 128, %s1818_s19, %s1988_s0, %s1987_s28, %s1987_s28, %s1967_s21  }
 0x4f3   : > { %836 = vrot.lane.b32.xlu0 %v1099_v10, %s1989_s23  ;;  %s390_s22 = scalar_lea.vmem [#allocation9], %s1802_s18  ;;  %s855_s24 = sand.u32 1, %s1594_s13  }
 0x4f4   : > { %s890_s25 = sshll.u32 %s390_s22, 4  ;;  %s397_s29 = scalar_lea.vmem [#allocation11], %s1802_s18  ;;  %s1857_s25 = int_to_ptr.vmem [resolvable:$true] %s890_s25 }
 0x4f5   : > { %s906_s16 = sshll.u32 %s397_s29, 4  ;;  %s1863_s19 = scalar_lea.hbm %s1955_s8, %s1809_s17  ;;  %s1865_s16 = int_to_ptr.vmem [resolvable:$true] %s906_s16 }
 0x4f6   : > { %s1871_s14 = scalar_lea.hbm %s1956_s9, %s1809_s17  ;;  %s1875_s23 = scalar_lea.sflag [#allocation10], %s855_s24 }
 0x4f7   : > { %s1405_s0 = scalar_lea.vmem %s1857_s25, 128  ;;  %s1521_s15 = smov [#allocation9]  }
 0x4f8   : > { %p1406_p7 = scmp.ne.s32.totalorder %s1857_s25, %s1405_s0  ;;  %s1409_s21 = sshll.u32 %s1521_s15, 4  ;;  %s1410_s21 = int_to_ptr.vmem [resolvable:$false] %s1409_s21 }
 0x4f9   : > { %s1411_s1 = scalar_lea.vmem %s1410_s21, 256  ;;  %p1412_p1 = scmp.lt.s32.totalorder %s1857_s25, %s1410_s21 }
 0x4fa   : > { %p1407_p9 = pnand %p1406_p7, %p1986_p0  ;;  %p1413_p13 = scmp.lt.s32.totalorder %s1411_s1, %s1405_s0 }
 0x4fc   : > { %p1408_p12 = pneg %p1407_p9  ;;  %p1414_p6 = por %p1413_p13, %p1412_p1 }
 0x4fe   : > { %p1415_p10 = pnand %p1414_p6, %p1408_p12 }
 0x54e   : > { %v843_v11 = vpop.permute.xlu1 %842  ;;  %v835_v12 = vpop.permute.xlu0 %834 }
 0x54f   : > { %848 = vst.msk [vmem:[%s397_s29] sm:$0xf] %vm831_vm2, %v843_v11  ;;  %840 = vst.msk [vmem:[%s390_s22] sm:$0xf] %vm831_vm2, %v835_v12 }
 0x563   : > { %v845_v13 = vpop.permute.xlu1 %844 }
 0x564   : > { %849 = vst.msk [vmem:[%s397_s29 + $0x4] sm:$0xf] %vm831_vm2, %v845_v13 }
 0x565   : > { %v837_v14 = vpop.permute.xlu0 %836 }
 0x566   : > { %841 = vst.msk [vmem:[%s390_s22 + $0x4] sm:$0xf] %vm831_vm2, %v837_v14 }
 0x567   : > { %1418 = shalt.err (!%p1415_p10)
}
 0x568   : > { %s1419_s17 = scalar_lea.hbm %s1863_s19, 128  ;;  %s1423_s29 = scalar_lea.hbm %s1955_s8, 256 }
 0x569   : > { %p1420_p4 = scmp.ne.s32.totalorder %s1863_s19, %s1419_s17  ;;  %p1424_p8 = scmp.lt.u32.totalorder %s1863_s19, %s1955_s8 }
 0x56a   : > { %p1425_p2 = scmp.lt.u32.totalorder %s1423_s29, %s1419_s17  ;;  %p1427_p7 = scmp.lt.u32.totalorder %s1419_s17, %s1863_s19 }
 0x56b   : > { %p1421_p5 = pnand %p1420_p4, %p1986_p0 }
 0x56c   : > { %p1426_p3 = por %p1425_p2, %p1424_p8 }
 0x56d   : > { %p1422_p11 = pneg %p1421_p5 }
 0x56e   : > { %p1428_p9 = por %p1427_p7, %p1426_p3 }
 0x570   : > { %p1429_p12 = pnand %p1428_p9, %p1422_p11 }
 0x572   : > { %1432 = shalt.err (!%p1429_p12)
}
 0x573   : > { %s1990_s1 = smov 4   ;;  %s1433_s18 = scalar_lea.vmem %s1865_s16, 128 }
 0x574   : > { %1213 = dma.vmem_to_hbm [thread:$0]  (%p1986_p0), %s1857_s25, 128, %s1863_s19, %s1875_s23, %s1987_s28, %s1987_s28, %s1990_s1  }
 0x575   : > { %p1434_p1 = scmp.ne.s32.totalorder %s1865_s16, %s1433_s18  ;;  %s1522_s0 = smov [#allocation11]  }
 0x576   : > { %s1437_s15 = sshll.u32 %s1522_s0, 4  ;;  %s1438_s15 = int_to_ptr.vmem [resolvable:$false] %s1437_s15 }
 0x577   : > { %p1435_p13 = pnand %p1434_p1, %p1986_p0  ;;  %s1439_s17 = scalar_lea.vmem %s1438_s15, 256 }
 0x578   : > { %p1440_p10 = scmp.lt.s32.totalorder %s1865_s16, %s1438_s15  ;;  %p1441_p4 = scmp.lt.s32.totalorder %s1439_s17, %s1433_s18 }
 0x579   : > { %p1436_p6 = pneg %p1435_p13 }
 0x57a   : > { %p1442_p5 = por %p1441_p4, %p1440_p10 }
 0x57c   : > { %p1443_p11 = pnand %p1442_p5, %p1436_p6 }
 0x57e   : > { %1446 = shalt.err (!%p1443_p11)
}
 0x57f   : > { %s1447_s25 = scalar_lea.hbm %s1871_s14, 128  ;;  %s1451_s24 = scalar_lea.hbm %s1956_s9, 256 }
 0x580   : > { %p1448_p8 = scmp.ne.s32.totalorder %s1871_s14, %s1447_s25  ;;  %p1452_p7 = scmp.lt.u32.totalorder %s1871_s14, %s1956_s9 }
 0x581   : > { %p1453_p9 = scmp.lt.u32.totalorder %s1451_s24, %s1447_s25  ;;  %p1455_p1 = scmp.lt.u32.totalorder %s1447_s25, %s1871_s14 }
 0x582   : > { %p1449_p2 = pnand %p1448_p8, %p1986_p0 }
 0x583   : > { %p1454_p12 = por %p1453_p9, %p1452_p7 }
 0x584   : > { %p1450_p3 = pneg %p1449_p2 }
 0x585   : > { %p1456_p13 = por %p1455_p1, %p1454_p12 }
 0x587   : > { %p1457_p6 = pnand %p1456_p13, %p1450_p3 }
 0x589   : > { %1460 = shalt.err (!%p1457_p6)
}
 0x58a   : > { %1214 = dma.vmem_to_hbm [thread:$0]  (%p1986_p0), %s1865_s16, 128, %s1871_s14, %s1875_s23, %s1987_s28, %s1987_s28, %s1990_s1  }
 0x58b PF: > { %s1991_s21 = sld [smem:[#allocation16_spill]]  ;;  %s921_s18 = sand.u32 1, %s1495_s30  }
 0x58c   : > { %p1993_p4 = scmp.ge.s32.totalorder %s1507_s12, 2  ;;  %s922_s0 = scalar_lea.sflag [#allocation4], %s921_s18 }
 0x591   : > { %p1992_p10 = scmp.ne.s32.totalorder %s1991_s21, 0 }
 0x593   : > { %p1230_p5 = pnand %p1993_p4, %p1992_p10 }
 0x595   : > { %1486 = dma.done.wait (!%p1230_p5), %s922_s0, 128  }
 0x596   : > { %1488 = vsyncadd (!%p1230_p5), %s922_s0, 4294967168  ;;  %s1994_s26 = sadd.s32 4294967294, %s1507_s12  }
 0x597   : > { %s930_s15 = sand.u32 1, %s1994_s26  }
 0x598   : > { %s931_s17 = scalar_lea.sflag [#allocation10], %s930_s15 }
 0x599   : > { %1490 = dma.done.wait (!%p1230_p5), %s931_s17, 256  }
 0x59a   : > { %1492 = vsyncadd (!%p1230_p5), %s931_s17, 4294967040  ;;  %p27_p0 = scmp.ge.s32.totalorder %s1691_s20, 4   ;;  %s1995_s30 = smov %s1499_s10 }
 0x59b   : > { %s1996_s10 = smov %s1503_s11  ;;  %s1997_s11 = smov %s1707_s27 }
 0x59c   : > { %s1998_s12 = smov %s1691_s20  ;;  %29 = sbr.rel (!%p27_p0) target bundleno = 11 (0xb), region = 133 }
 0x5a3   :  { %945 = vsyncpa [#allocation3], 1 }
 0x5a4   :  { %947 = vsyncpa [#allocation3 + $0x1], 1 }
 0x5a5   :  { %948 = vsyncpa [#allocation6], 1 }
 0x5a6   :  { %949 = vsyncpa [#allocation4], 1 }
 0x5a7   :  { %951 = vsyncpa [#allocation4 + $0x1], 1 }
 0x5a8   :  { %952 = vsyncpa [#allocation10], 1 }
 0x5a9   :  { %954 = vsyncpa [#allocation10 + $0x1], 1 }

</bundles_post_ra>
